<compile_context>
chip_gen: v6e
topology: v6e:2x2x1
jax: 0.10.0
libtpu: 0.0.40
codegen_flags: <defaults>
</compile_context>

<pallas_src>
import functools

import jax
import jax.numpy as jnp
from jax.experimental import pallas as pl
from jax.experimental.pallas import tpu as pltpu


# ---------------------------------------------------------------------------
# Kernels.  Grid = (row tiles, K tiles); the output block index ignores k so
# the output stays resident across the K loop, and the f32 accumulator lives
# in VMEM scratch (persists across grid steps, re-initialized at k == 0).
# ---------------------------------------------------------------------------
def prop_relu_transform_kernel(a_ref, xw_ref, b_ref, wn_ref, o_ref, acc_ref):
    """o[rows] = relu(A[rows, :] @ XW + b) @ W_next  (K-tiled propagate)."""
    k = pl.program_id(1)

    @pl.when(k == 0)
    def _():
        acc_ref[...] = jnp.zeros_like(acc_ref)

    acc_ref[...] += jnp.dot(a_ref[...], xw_ref[...],
                            preferred_element_type=jnp.float32)

    @pl.when(k == pl.num_programs(1) - 1)
    def _():
        # TODO(synk): torch.nn.Dropout(p=0.5) in training mode (random mask +
        # 2x scale) is not reproduced; eval-mode identity is used.
        h = jnp.maximum(acc_ref[...] + b_ref[...], 0.0)
        o_ref[...] = jnp.dot(h.astype(wn_ref.dtype), wn_ref[...],
                             preferred_element_type=jnp.float32
                             ).astype(o_ref.dtype)


def prop_softmax_kernel(a_ref, xw_ref, b_ref, o_ref, acc_ref, *, num_valid):
    """o[rows] = softmax(A[rows, :] @ XW + b) over the first num_valid lanes."""
    k = pl.program_id(1)

    @pl.when(k == 0)
    def _():
        acc_ref[...] = jnp.zeros_like(acc_ref)

    acc_ref[...] += jnp.dot(a_ref[...], xw_ref[...],
                            preferred_element_type=jnp.float32)

    @pl.when(k == pl.num_programs(1) - 1)
    def _():
        z = acc_ref[...] + b_ref[...]
        col = jax.lax.broadcasted_iota(jnp.int32, z.shape, 1)
        z = jnp.where(col < num_valid, z, jnp.float32(-1e30))   # padded lanes
        z = z - jnp.max(z, axis=1, keepdims=True)
        e = jnp.exp(z)
        denom = jnp.sum(e, axis=1, keepdims=True)
        o_ref[...] = (e * pl.reciprocal(denom, approx=True)).astype(o_ref.dtype)


# ---------------------------------------------------------------------------
# Wrapper: tiling heuristics, padding, bf16 casts, grids, BlockSpecs.
# ---------------------------------------------------------------------------
def _round_up(v, m):
    return (v + m - 1) // m * m


def _cdiv(a, b):
    return (a + b - 1) // b


def _pad2(a, rows, cols):
    r, c = a.shape
    return jnp.pad(a, ((0, rows - r), (0, cols - c)))


def _choose_tiles(n, row_tile=256, k_tile=2048):
    """Pick (tm, tk, npad, gk): npad is a multiple of both tm and tk.

    The row tile drops to 128 whenever tm-alignment would add noticeable
    quadratic padding to A (small N); the K tile is chosen near k_tile while
    minimizing column padding of A.
    """
    row_tile = max(128, (row_tile // 128) * 128)
    np128 = _round_up(n, 128)
    # Adaptive row tile: avoid tm-coupled quadratic padding of A (>5% waste).
    tm = row_tile if (_round_up(n, row_tile) - np128) * 20 <= np128 else 128
    npad0 = _round_up(np128, tm)
    blocks = npad0 // tm
    kt_blocks = max(1, min(k_tile // tm, blocks))
    # Small search over the K-grid size to minimize padding of A's columns.
    gk_min = _cdiv(blocks, kt_blocks)
    best = None
    for gk in range(gk_min, min(blocks, gk_min + 8) + 1):
        tkb = _cdiv(blocks, gk)
        waste = gk * tkb - blocks
        if best is None or waste < best[0]:
            best = (waste, gk, tkb)
        if waste == 0:
            break
    _, gk, tkb = best
    tk = tm * tkb
    npad = gk * tk
    return tm, tk, npad, gk


def _vmem_limit_bytes():
    """Generation-aware scoped VMEM limit (~25% headroom, capped at 96 MiB)."""
    try:
        cap = int(pltpu.get_tpu_info().vmem_capacity_bytes)
    except Exception:
        cap = 64 * 1024 * 1024          # conservative (v7x physical per TC)
    return min(cap * 3 // 4, 96 * 1024 * 1024)


def _propagate(kernel, out_dtype, a_p, xw, b_p, w_next, *,
               width_in, width_out, tm, tk, npad, gk, vmem_limit, transc=0):
    """pallas_call for one K-tiled propagate layer (fused epilogue in kernel)."""
    grid = (npad // tm, gk)
    in_specs = [
        pl.BlockSpec((tm, tk), lambda i, k: (i, k)),         # A row/col tile
        pl.BlockSpec((tk, width_in), lambda i, k: (k, 0)),   # XW K-block
        pl.BlockSpec((1, width_in), lambda i, k: (0, 0)),    # bias (invariant)
    ]
    operands = (a_p, xw, b_p)
    flops = 2 * npad * npad * width_in
    if w_next is not None:
        in_specs.append(pl.BlockSpec((width_in, width_out), lambda i, k: (0, 0)))
        operands = operands + (w_next,)
        flops += 2 * npad * width_in * width_out
    bytes_accessed = (npad * npad * a_p.dtype.itemsize
                      + (npad // tm) * npad * width_in * xw.dtype.itemsize
                      + npad * width_out * jnp.dtype(out_dtype).itemsize)
    return pl.pallas_call(
        kernel,
        out_shape=jax.ShapeDtypeStruct((npad, width_out), out_dtype),
        grid=grid,
        in_specs=in_specs,
        out_specs=pl.BlockSpec((tm, width_out), lambda i, k: (i, 0)),
        scratch_shapes=[pltpu.VMEM((tm, width_in), jnp.float32)],
        compiler_params=pltpu.CompilerParams(
            dimension_semantics=("parallel", "arbitrary"),
            vmem_limit_bytes=vmem_limit),
        cost_estimate=pl.CostEstimate(
            flops=flops, transcendentals=transc, bytes_accessed=bytes_accessed),
    )(*operands)


def gcn_net3_forward(a_hat, x, params, *, row_tile=256, k_tile=2048):
    """GCNConv -> ReLU -> GCNConv -> ReLU -> GCNConv -> softmax(dim=1)."""
    w1, b1, w2, b2, w3, b3 = params
    n, f = x.shape
    h1, h2, c = w1.shape[1], w2.shape[1], w3.shape[1]

    tm, tk, npad, gk = _choose_tiles(n, row_tile, k_tile)
    fp, h1p, h2p, cpd = (_round_up(d, 128) for d in (f, h1, h2, c))
    vmem_limit = _vmem_limit_bytes()

    # bf16 MXU inputs (accumulation stays f32 inside the kernels); zero padding.
    a_p = _pad2(a_hat, npad, npad).astype(jnp.bfloat16)
    x_p = _pad2(x, npad, fp).astype(jnp.bfloat16)
    w1_p = _pad2(w1, fp, h1p).astype(jnp.bfloat16)
    w2_p = _pad2(w2, h1p, h2p).astype(jnp.bfloat16)
    w3_p = _pad2(w3, h2p, cpd).astype(jnp.bfloat16)
    b1_p = _pad2(b1, 1, h1p).astype(jnp.float32)
    b2_p = _pad2(b2, 1, h2p).astype(jnp.float32)
    b3_p = _pad2(b3, 1, cpd).astype(jnp.float32)

    # Layer-1 feature transform: a thin (N,F)@(F,H1) matmul, not worth its own
    # pallas_call launch + HBM round trip; let XLA handle it.
    xw1 = jnp.dot(x_p, w1_p,
                  preferred_element_type=jnp.float32).astype(jnp.bfloat16)

    # Layer-1 propagate + ReLU, fused with layer-2 transform.
    xw2 = _propagate(prop_relu_transform_kernel, jnp.bfloat16,
                     a_p, xw1, b1_p, w2_p,
                     width_in=h1p, width_out=h2p,
                     tm=tm, tk=tk, npad=npad, gk=gk, vmem_limit=vmem_limit)

    # Layer-2 propagate + ReLU, fused with layer-3 transform.
    xw3 = _propagate(prop_relu_transform_kernel, jnp.bfloat16,
                     a_p, xw2, b2_p, w3_p,
                     width_in=h2p, width_out=cpd,
                     tm=tm, tk=tk, npad=npad, gk=gk, vmem_limit=vmem_limit)

    # Layer-3 propagate + masked row softmax (bf16 writeback, sliced below).
    out = _propagate(functools.partial(prop_softmax_kernel, num_valid=c),
                     jnp.bfloat16, a_p, xw3, b3_p, None,
                     width_in=cpd, width_out=cpd,
                     tm=tm, tk=tk, npad=npad, gk=gk, vmem_limit=vmem_limit,
                     transc=npad * (cpd + 1))

    return out[:n, :c].astype(jnp.float32)


# ---------------------------------------------------------------------------
# Plain-JAX glue: PyG GCNConv normalization A_hat = D^-1/2 (A + I) D^-1/2.
# ---------------------------------------------------------------------------
def normalized_adjacency(edge_index, num_nodes):
    # Self-loops are appended unconditionally; edge_index is assumed loop-free
    # (matches PyG add_self_loops semantics on loop-free input).
    src, dst = edge_index[0], edge_index[1]
    loop = jnp.arange(num_nodes, dtype=src.dtype)
    src = jnp.concatenate([src, loop])
    dst = jnp.concatenate([dst, loop])
    deg = jnp.zeros((num_nodes,), jnp.float32).at[dst].add(1.0)
    dinv = jnp.where(deg > 0.0, 1.0 / jnp.sqrt(deg), 0.0)
    vals = dinv[dst] * dinv[src]
    return jnp.zeros((num_nodes, num_nodes), jnp.float32).at[dst, src].add(vals)


def glorot(key, fan_in, fan_out):
    limit = jnp.sqrt(6.0 / (fan_in + fan_out)).astype(jnp.float32)
    return jax.random.uniform(key, (fan_in, fan_out), jnp.float32, -limit, limit)


if __name__ == "__main__":
    # Small but non-trivial problem: exercises lane padding (C=7 -> 128 lanes),
    # a multi-step row grid (N=300 -> 3 tiles of 128) and the K-tiled reduction.
    N, F, H1, H2, C = 300, 32, 64, 32, 7

    key = jax.random.PRNGKey(0)
    kx, k1, k2, k3 = jax.random.split(key, 4)

    x = jax.random.normal(kx, (N, F), jnp.float32)

    # Deterministic edge_index: bidirectional ring + bidirectional long hops.
    idx = jnp.arange(N, dtype=jnp.int32)
    ring_dst = (idx + 1) % N
    hop_dst = (idx * 7 + 3) % N
    src = jnp.concatenate([idx, ring_dst, idx, hop_dst])
    dst = jnp.concatenate([ring_dst, idx, hop_dst, idx])
    edge_index = jnp.stack([src, dst])

    a_hat = normalized_adjacency(edge_index, N)

    # GCNConv params: glorot weights, zero biases (PyG defaults), deterministic.
    params = (
        glorot(k1, F, H1), jnp.zeros((1, H1), jnp.float32),
        glorot(k2, H1, H2), jnp.zeros((1, H2), jnp.float32),
        glorot(k3, H2, C), jnp.zeros((1, C), jnp.float32),
    )

    out = jax.block_until_ready(gcn_net3_forward(a_hat, x, params))

    # Plain-JAX f32 reference (eval-mode dropout = identity).
    w1, b1, w2, b2, w3, b3 = params
    h = jnp.maximum(a_hat @ (x @ w1) + b1, 0.0)
    h = jnp.maximum(a_hat @ (h @ w2) + b2, 0.0)
    ref = jax.nn.softmax(a_hat @ (h @ w3) + b3, axis=1)

    assert out.shape == (N, C)
    assert bool(jnp.allclose(jnp.sum(out, axis=1), 1.0, atol=2e-2))
    assert bool(jnp.allclose(out, ref, atol=3e-2))
    print("KERNEL_OK")
</pallas_src>

<mosaic_0001>
module attributes {stable_mosaic.version = 11 : i64} {
  func.func @prop_relu_transform_kernel(%arg0: i32, %arg1: i32, %arg2: memref<128x384xbf16, #tpu.memory_space<vmem>>, %arg3: memref<384x128xbf16, #tpu.memory_space<vmem>>, %arg4: memref<1x128xf32, #tpu.memory_space<vmem>>, %arg5: memref<128x128xbf16, #tpu.memory_space<vmem>>, %arg6: memref<128x128xbf16, #tpu.memory_space<vmem>>, %arg7: memref<128x128xf32, #tpu.memory_space<vmem>>) attributes {dimension_semantics = [#tpu.dimension_semantics<parallel>, #tpu.dimension_semantics<arbitrary>], iteration_bounds = array<i64: 3, 1>, scalar_prefetch = 0 : i64, scratch_operands = 1 : i64, tpu.core_type = #tpu.core_type<tc>, window_params = [{transform_indices = @transform_0, window_bounds = array<i64: 128, 384>}, {transform_indices = @transform_1, window_bounds = array<i64: 384, 128>}, {pipeline_mode = #tpu.pipeline_mode<synchronous>, transform_indices = @transform_2, window_bounds = array<i64: 1, 128>}, {pipeline_mode = #tpu.pipeline_mode<synchronous>, transform_indices = @transform_3, window_bounds = array<i64: 128, 128>}, {transform_indices = @transform_4, window_bounds = array<i64: 128, 128>}]} {
    %c0_i32 = arith.constant 0 : i32
    %0 = arith.cmpi eq, %arg1, %c0_i32 : i32
    %1 = arith.extui %0 : i1 to i32
    %c0_i32_0 = arith.constant 0 : i32
    %2 = arith.cmpi ne, %1, %c0_i32_0 : i32
    scf.if %2 {
      %cst_10 = arith.constant 0.000000e+00 : f32
      %12 = vector.broadcast %cst_10 : f32 to vector<128x128xf32>
      %c0_11 = arith.constant 0 : index
      %c0_12 = arith.constant 0 : index
      %13 = vector.load %arg7[%c0_11, %c0_12] : memref<128x128xf32, #tpu.memory_space<vmem>>, vector<128x128xf32>
      tpu.vector_store %arg7[%c0_11, %c0_12], %12 {strides = array<i32>} : memref<128x128xf32, #tpu.memory_space<vmem>>, vector<128x128xf32>,
    } else {
    }
    %c0 = arith.constant 0 : index
    %c0_1 = arith.constant 0 : index
    %3 = vector.load %arg7[%c0, %c0_1] : memref<128x128xf32, #tpu.memory_space<vmem>>, vector<128x128xf32>
    %c0_2 = arith.constant 0 : index
    %c0_3 = arith.constant 0 : index
    %4 = vector.load %arg2[%c0_2, %c0_3] : memref<128x384xbf16, #tpu.memory_space<vmem>>, vector<128x384xbf16>
    %c0_4 = arith.constant 0 : index
    %c0_5 = arith.constant 0 : index
    %5 = vector.load %arg3[%c0_4, %c0_5] : memref<384x128xbf16, #tpu.memory_space<vmem>>, vector<384x128xbf16>
    %cst = arith.constant dense<0.000000e+00> : vector<128x128xf32>
    %6 = tpu.matmul %4, %5, %cst {dimension_numbers = #tpu.dot_dimension_numbers<[1], [0], [0], [1], [0, 0, 1, 1], [], []>} : vector<128x384xbf16>, vector<384x128xbf16>, vector<128x128xf32> -> vector<128x128xf32>
    %7 = arith.addf %3, %6 : vector<128x128xf32>
    %c0_6 = arith.constant 0 : index
    %c0_7 = arith.constant 0 : index
    %8 = vector.load %arg7[%c0_6, %c0_7] : memref<128x128xf32, #tpu.memory_space<vmem>>, vector<128x128xf32>
    tpu.vector_store %arg7[%c0_6, %c0_7], %7 {strides = array<i32>} : memref<128x128xf32, #tpu.memory_space<vmem>>, vector<128x128xf32>,
    %c0_i32_8 = arith.constant 0 : i32
    %9 = arith.cmpi eq, %arg1, %c0_i32_8 : i32
    %10 = arith.extui %9 : i1 to i32
    %c0_i32_9 = arith.constant 0 : i32
    %11 = arith.cmpi ne, %10, %c0_i32_9 : i32
    scf.if %11 {
      %c0_10 = arith.constant 0 : index
      %c0_11 = arith.constant 0 : index
      %12 = vector.load %arg7[%c0_10, %c0_11] : memref<128x128xf32, #tpu.memory_space<vmem>>, vector<128x128xf32>
      %c0_12 = arith.constant 0 : index
      %c0_13 = arith.constant 0 : index
      %13 = vector.load %arg4[%c0_12, %c0_13] : memref<1x128xf32, #tpu.memory_space<vmem>>, vector<1x128xf32>
      %14 = vector.broadcast %13 : vector<1x128xf32> to vector<128x128xf32>
      %15 = arith.addf %12, %14 : vector<128x128xf32>
      %cst_14 = arith.constant 0.000000e+00 : f32
      %16 = vector.broadcast %cst_14 : f32 to vector<128x128xf32>
      %17 = arith.maximumf %15, %16 : vector<128x128xf32>
      %18 = arith.truncf %17 : vector<128x128xf32> to vector<128x128xbf16>
      %c0_15 = arith.constant 0 : index
      %c0_16 = arith.constant 0 : index
      %19 = vector.load %arg5[%c0_15, %c0_16] : memref<128x128xbf16, #tpu.memory_space<vmem>>, vector<128x128xbf16>
      %cst_17 = arith.constant dense<0.000000e+00> : vector<128x128xf32>
      %20 = tpu.matmul %18, %19, %cst_17 {dimension_numbers = #tpu.dot_dimension_numbers<[1], [0], [0], [1], [0, 0, 1, 1], [], []>} : vector<128x128xbf16>, vector<128x128xbf16>, vector<128x128xf32> -> vector<128x128xf32>
      %21 = arith.truncf %20 : vector<128x128xf32> to vector<128x128xbf16>
      %c0_18 = arith.constant 0 : index
      %c0_19 = arith.constant 0 : index
      %22 = vector.load %arg6[%c0_18, %c0_19] : memref<128x128xbf16, #tpu.memory_space<vmem>>, vector<128x128xbf16>
      tpu.vector_store %arg6[%c0_18, %c0_19], %21 {strides = array<i32>} : memref<128x128xbf16, #tpu.memory_space<vmem>>, vector<128x128xbf16>,
    } else {
    }
    return
  }
  func.func @transform_0(%arg0: i32, %arg1: i32) -> (i32, i32) {
    %c0_i32 = arith.constant 0 : i32
    return %arg0, %arg1 : i32, i32
  }
  func.func @transform_1(%arg0: i32, %arg1: i32) -> (i32, i32) {
    %c0_i32 = arith.constant 0 : i32
    %c0_i32_0 = arith.constant 0 : i32
    return %arg1, %c0_i32 : i32, i32
  }
  func.func @transform_2(%arg0: i32, %arg1: i32) -> (i32, i32) {
    %c0_i32 = arith.constant 0 : i32
    %c0_i32_0 = arith.constant 0 : i32
    %c0_i32_1 = arith.constant 0 : i32
    return %c0_i32, %c0_i32_0 : i32, i32
  }
  func.func @transform_3(%arg0: i32, %arg1: i32) -> (i32, i32) {
    %c0_i32 = arith.constant 0 : i32
    %c0_i32_0 = arith.constant 0 : i32
    %c0_i32_1 = arith.constant 0 : i32
    return %c0_i32, %c0_i32_0 : i32, i32
  }
  func.func @transform_4(%arg0: i32, %arg1: i32) -> (i32, i32) {
    %c0_i32 = arith.constant 0 : i32
    %c0_i32_0 = arith.constant 0 : i32
    return %arg0, %c0_i32 : i32, i32
  }
}

</mosaic_0001>

<bundles_post_ra>
// kernel: tpu_custom_call.1
= control target key start
LH: loop header
LB: loop body
LE: loop exit
PB: predicated region body
PF: predicated region fallthrough
CT: control target
= control target key end

     0   :  { %s2230_s0 = inlined_call_operand.hbm [shape: bf16[384,384], index: 0, kind: input, shape index: {}]   ;;  %s2231_s1 = inlined_call_operand.hbm [shape: bf16[384,128], index: 1, kind: input, shape index: {}]   ;;  %s2232_s2 = inlined_call_operand.vmem [shape: f32[1,128], index: 2, kind: input, shape index: {}]   ;;  %s2233_s3 = inlined_call_operand.hbm [shape: bf16[128,128], index: 3, kind: input, shape index: {}]   ;;  %s2234_s4 = inlined_call_operand.hbm [shape: bf16[384,128], index: 4, kind: output, shape index: {}]  }
   0x1   :  { %2238 = sst [smem:[#allocation13_spill]] %s2231_s1 }
   0x2   :  { %9 = vsyncpa [#allocation4], 0 }
   0x3   :  { %11 = vsyncpa [#allocation4 + $0x1], 0 }
   0x4   :  { %12 = vsyncpa [#allocation7], 0 }
   0x5   :  { %13 = vsyncpa [#allocation5], 0 }
   0x6   :  { %15 = vsyncpa [#allocation5 + $0x1], 0  ;;  %s1987_s15 = smov 0   ;;  %s1989_s16 = smov 0  }
   0x7   :  { %s1991_s17 = smov 0   ;;  %s1993_s18 = smov 0  }
   0x8   :  { %s1995_s19 = smov 0   ;;  %s1997_s20 = smov 0  }
   0x9 LB: > { %s1315_s21 = sadd.s32 4294967295, %s1950_s20   ;;  %s1316_s22 = sadd.s32 4294967294, %s1950_s20   ;;  %s1950_s20 = sphi %s1997_s20, %s21_s20   ;;  %s1946_s19 = sphi %s1995_s19, %s2255_s19   ;;  %s1942_s18 = sphi %s1993_s18, %s2254_s18   ;;  %s1938_s17 = sphi %s1991_s17, %s2253_s17   ;;  %s1934_s16 = sphi %s1989_s16, %s2252_s16   ;;  %s1930_s15 = sphi %s1987_s15, %s2251_s15  }
   0xa   : > { %p55_p0 = scmp.ne.s32.totalorder %s1934_s16, %s1930_s15  ;;  %p2021_p1 = scmp.eq.s32.totalorder %s1315_s21, 0 }
   0xb   : > { %p2025_p2 = scmp.eq.s32.totalorder %s1315_s21, 2  ;;  %p153_p3 = scmp.eq.s32.totalorder %s1316_s22, 2 }
   0xc   : > { %s2239_s23 = scalar_select %p2021_p1, 1, 0 }
   0xd   : > { %p2031_p4 = por %p2021_p1, %p55_p0  ;;  %p1317_p5 = scmp.ge.s32.totalorder %s1950_s20, 1 }
   0xe   : > { %p2036_p6 = por %p153_p3, %p55_p0  ;;  %p160_p7 = scmp.lt.s32.totalorder %s1950_s20, 4 }
   0xf   : > { %s2241_s25 = scalar_select %p2031_p4, 1, 0 }
  0x10   : > { %s2242_s26 = scalar_select %p2036_p6, 1, 0 }
  0x11   : > { %p2041_p8 = pnand %p1317_p5, %p160_p7  ;;  %s1952_s28 = smov [#allocation6]  }
  0x12   : > { %s175_s29 = sshll.u32 %s1952_s28, 4  ;;  %s1953_s5 = smov [#allocation8]   ;;  %s176_s29 = int_to_ptr.vmem [resolvable:$true] %s175_s29 }
  0x13   : > { %p1645_p9 = pneg %p2041_p8  ;;  %s191_s6 = sshll.u32 %s1953_s5, 4  ;;  %s192_s6 = int_to_ptr.vmem [resolvable:$true] %s191_s6 }
  0x14   : > { %s1797_s7 = scalar_lea.vmem %s176_s29, 3072  ;;  %p1805_p3 = scmp.lt.s32.totalorder %s176_s29, %s176_s29 }
  0x15   : > { %p2049_p10 = pnand %p1645_p9, %p2021_p1  ;;  %p1798_p12 = scmp.ne.s32.totalorder %s176_s29, %s1797_s7 }
  0x16   : > { %p1806_p5 = scmp.lt.s32.totalorder %s1797_s7, %s1797_s7 }
  0x17   : > { %p1788_p11 = pneg %p2049_p10 }
  0x18   : > { %p1807_p7 = por %p1806_p5, %p1805_p3 }
  0x19   : > { %p1800_p13 = pnand %p1798_p12, %p1788_p11 }
  0x1b   : > { %p1801_p0 = pneg %p1800_p13 }
  0x1d   : > { %p1808_p9 = pnand %p1807_p7, %p1801_p0 }
  0x1f   : > { %1811 = shalt.err (!%p1808_p9)
}
  0x20   : > { %s1954_s8 = smov 64   ;;  %s1955_s9 = smov 4  }
  0x21   : > { %s2245_s1 = sld [smem:[#allocation13_spill]]  ;;  %s1823_s12 = scalar_lea.vmem %s192_s6, 1024 }
  0x22   : > { %p1824_p6 = scmp.ne.s32.totalorder %s192_s6, %s1823_s12  ;;  %p1831_p1 = scmp.lt.s32.totalorder %s192_s6, %s192_s6 }
  0x23   : > { %p1832_p4 = scmp.lt.s32.totalorder %s1823_s12, %s1823_s12 }
  0x24   : > { %p1826_p12 = pnand %p1824_p6, %p1788_p11 }
  0x25   : > { %p1833_p3 = por %p1832_p4, %p1831_p1 }
  0x26   : > { %p1827_p13 = pneg %p1826_p12 }
  0x27   : > { %1648 = dma.hbm_to_vmem [thread:$0]  (!%p2049_p10), %s2245_s1, 3072, %s176_s29, [#allocation7], %s1954_s8, %s1954_s8, %s1955_s9  }
  0x28   : > { %p1834_p0 = pnand %p1833_p3, %p1827_p13 }
  0x2a   : > { %1837 = shalt.err (!%p1834_p0)
}
  0x2b   : > { %1651 = dma.hbm_to_vmem [thread:$0]  (!%p2049_p10), %s2233_s3, 1024, %s192_s6, [#allocation7], %s1954_s8, %s1954_s8, %s1955_s9  }
  0x2c   : > { %s33_s21 = sadd.s32 1, %s1946_s19  ;;  %s42_s22 = sadd.s32 1, %s1938_s17 }
  0x2d   : > { %p35_p1 = scmp.ge.s32.totalorder %s33_s21, 3  ;;  %p49_p4 = scmp.ne.s32.totalorder %s1938_s17, %s1934_s16 }
  0x2e   : > { %p50_p6 = scmp.eq.s32.totalorder %s1950_s20, 0  ;;  %p1662_p11 = scmp.lt.s32.totalorder %s1950_s20, 3 }
  0x2f   : > { %s2257_s21 = smov (%p35_p1, %s33_s21), 0  ;;  %p2081_p7 = por %p2025_p2, %p49_p4 }
  0x30   : > { %p51_p5 = por %p50_p6, %p49_p4  ;;  %s37_s29 = ssub.s32 %s1946_s19, %s2257_s21 }
  0x31   : > { %s205_s30 = sand.u32 1, %s1938_s17   ;;  %p40_p9 = scmp.eq.s32.totalorder %s37_s29, 0 }
  0x32   : > { %s1630_s5 = smul.u32 192, %s205_s30  ;;  %p2088_p10 = pnand %p1662_p11, %p51_p5 }
  0x33   : > { %s2093_s7 = scalar_select %p40_p9, %s1938_s17, %s42_s22  }
  0x34   : > { %s1631_s8 = smul.u32 3072, %s1946_s19  ;;  %s209_s9 = scalar_lea.vmem [#allocation3], %s1630_s5 }
  0x35   : > { %s219_s10 = sshll.u32 %s209_s9, 4  ;;  %s206_s13 = scalar_lea.sflag [#allocation4], %s205_s30  ;;  %s220_s10 = int_to_ptr.vmem [resolvable:$true] %s219_s10 }
  0x36   : > { %s218_s12 = scalar_lea.hbm %s2230_s0, %s1631_s8  ;;  %p1840_p2 = pneg %p2088_p10 }
  0x37   : > { %s1851_s14 = scalar_lea.vmem %s220_s10, 3072  ;;  %s1956_s29 = smov [#allocation3]  }
  0x38   : > { %p1852_p12 = scmp.ne.s32.totalorder %s220_s10, %s1851_s14  ;;  %s1856_s1 = sshll.u32 %s1956_s29, 4  ;;  %s1857_s1 = int_to_ptr.vmem [resolvable:$false] %s1856_s1 }
  0x39   : > { %s1858_s22 = scalar_lea.vmem %s1857_s1, 6144  ;;  %p1859_p0 = scmp.lt.s32.totalorder %s220_s10, %s1857_s1 }
  0x3a   : > { %p1854_p13 = pnand %p1852_p12, %p1840_p2  ;;  %p1860_p1 = scmp.lt.s32.totalorder %s1858_s22, %s1851_s14 }
  0x3c   : > { %p1855_p3 = pneg %p1854_p13  ;;  %p1861_p4 = por %p1860_p1, %p1859_p0 }
  0x3e   : > { %p1862_p6 = pnand %p1861_p4, %p1855_p3 }
  0x40   : > { %1865 = shalt.err (!%p1862_p6)
}
  0x41   : > { %s1957_s5 = smov 192   ;;  %s1958_s8 = smov 12  }
  0x42   : > { %1655 = dma.hbm_to_vmem [thread:$0]  (!%p2088_p10), %s218_s12, 3072, %s220_s10, %s206_s13, %s1957_s5, %s1957_s5, %s1958_s8  }
  0x43   : > { %231 = sbr.rel (%p2041_p8) target bundleno = 589 (0x24d), region = 36  ;;  %s2106_s30 = sand.u32 (!%p2041_p8), 1, %s1934_s16  }
  0x44   : > { %s1632_s9 = smul.u32 (!%p2041_p8), 192, %s2106_s30  ;;  %s234_s1 = scalar_lea.sflag (!%p2041_p8), [#allocation4], %s2106_s30 }
  0x45   : > { %p2248_p11 = scmp.ne.s32.totalorder (!%p2041_p8), %s2241_s25, 0 }
  0x46   : > { %s2110_s11 = scalar_lea.vmem (!%p2041_p8), [#allocation3], %s1632_s9 }
  0x48   : > { %1917 = dma.done.wait (%p2248_p11), %s234_s1, 3072  }
  0x49   : > { %1919 = vsyncadd (%p2248_p11), %s234_s1, 4294964224  ;;  %p2249_p5 = scmp.ne.s32.totalorder %s2239_s23, 0 }
  0x4b   : > { %1921 = dma.done.wait (%p2249_p5), [#allocation7], 4096  }
  0x4c   : > { %1923 = vsyncadd (%p2249_p5), [#allocation7], 4294963200  ;;  %v1722_v0 = vld [vmem:[#allocation6 + $0x78] sm:$0xff]   ;;  %v1725_v3 = vld [vmem:[#allocation6 + $0x70] sm:$0xff]   ;;  %s1327_s27 = sshll.u32 %s2106_s30, 6  ;;  %s1422_s24 = sshll.u32 %s1942_s18, 10 }
  0x4d   : > { %v1723_v1 = vld [vmem:[#allocation6 + $0x38] sm:$0xff]   ;;  %1470 = vmatprep.subr.bf16.mxu0 %v1722_v0  ;;  %v1726_v4 = vld [vmem:[#allocation6 + $0x30] sm:$0xff]   ;;  %v1728_v6 = vld [vmem:[#allocation6 + $0x68] sm:$0xff]   ;;  %s2166_s6 = scalar_lea.vmem [#allocation9], %s1327_s27  ;;  %s2181_s14 = scalar_lea.hbm %s2234_s4, %s1422_s24 }
  0x4e   : > { %v1724_v2 = vld [vmem:[#allocation6 + $0xb8] sm:$0xff]   ;;  %1471 = vmatpush3.bf16.msra.mxu0 %v1723_v1  ;;  %v1727_v5 = vld [vmem:[#allocation6 + $0xb0] sm:$0xff]   ;;  %v1729_v7 = vld [vmem:[#allocation6 + $0x28] sm:$0xff]   ;;  %s1210_s10 = sshll.u32 %s2166_s6, 4  ;;  %s1197_s29 = scalar_lea.sflag [#allocation5], %s2106_s30  ;;  %s2176_s10 = int_to_ptr.vmem [resolvable:$true] %s1210_s10 }
  0x4f   : > { %1566 = vmatprep.subr.bf16.mxu1 %v1724_v2  ;;  %1472 = vmatprep.subr.bf16.mxu0 %v1725_v3  ;;  %v1730_v8 = vld [vmem:[#allocation6 + $0xa8] sm:$0xff]   ;;  %v1731_v9 = vld [vmem:[#allocation6 + $0x60] sm:$0xff]   ;;  %v1734_v12 = vld [vmem:[#allocation6 + $0x58] sm:$0xff]   ;;  %s1866_s22 = scalar_lea.vmem %s2176_s10, 1024  ;;  %s1959_s18 = smov [#allocation9]  }
  0x50   : > { %1567 = vmatpush3.bf16.msra.mxu1 %v1724_v2  ;;  %v1732_v10 = vld [vmem:[#allocation6 + $0x20] sm:$0xff]   ;;  %v1736_v13 = vld [vmem:[#allocation6 + $0x98] sm:$0xff]   ;;  %v1737_v15 = vld [vmem:[#allocation6 + $0x50] sm:$0xff]   ;;  %p1867_p8 = scmp.ne.s32.totalorder %s2176_s10, %s1866_s22  ;;  %s1870_s5 = sshll.u32 %s1959_s18, 4  ;;  %s1871_s5 = int_to_ptr.vmem [resolvable:$false] %s1870_s5 }
  0x51   : > { %1568 = vmatprep.subr.bf16.mxu1 %v1727_v5  ;;  %v1733_v11 = vld [vmem:[#allocation6 + $0xa0] sm:$0xff]   ;;  %v1735_v14 = vld [vmem:[#allocation6 + $0x18] sm:$0xff]   ;;  %v1739_v16 = vld [vmem:[#allocation6 + $0x90] sm:$0xff]   ;;  %s1872_s8 = scalar_lea.vmem %s1871_s5, 2048  ;;  %p1873_p2 = scmp.lt.s32.totalorder %s2176_s10, %s1871_s5 }
  0x52   : > { %1473 = vmatpush3.bf16.msra.mxu0 %v1726_v4  ;;  %v1738_v17 = vld [vmem:[#allocation6 + $0x10] sm:$0xff]   ;;  %v1740_v18 = vld [vmem:[#allocation6 + $0x48] sm:$0xff]   ;;  %v1743_v21 = vld [vmem:[#allocation6 + $0x40] sm:$0xff]   ;;  %p1868_p9 = pnand %p1867_p8, %p2081_p7  ;;  %p1874_p12 = scmp.lt.s32.totalorder %s1872_s8, %s1866_s22 }
  0x53   : > { %1474 = vmatprep.subr.bf16.mxu0 %v1728_v6  ;;  %v1741_v19 = vld [vmem:[#allocation6 + $0x8] sm:$0xff]   ;;  %v1745_v22 = vld [vmem:[#allocation6 + $0x80] sm:$0xff]   ;;  %v1758_v32 = vld [vmem:[%s2110_s11 + $0x50] ss:$12 sps:$4 sm:$0xff]  }
  0x54   : > { %1569 = vmatpush3.bf16.msra.mxu1 %v1727_v5  ;;  %v1742_v20 = vld [vmem:[#allocation6 + $0x88] sm:$0xff]   ;;  %v1748_v23 = vld [vmem:[%s2110_s11 + $0x4] ss:$12 sps:$4 sm:$0xff]   ;;  %v1754_v31 = vld [vmem:[%s2110_s11 + $0x34] ss:$12 sps:$4 sm:$0xff]   ;;  %p1869_p10 = pneg %p1868_p9  ;;  %p1875_p13 = por %p1874_p12, %p1873_p2 }
  0x55   : > { %1570 = vmatprep.subr.bf16.mxu1 %v1730_v8  ;;  %v1749_v24 = vld [vmem:[%s2110_s11 + $0x8] ss:$12 sps:$4 sm:$0xff]   ;;  %v1744_v25 = vld [vmem:[#allocation6] sm:$0xff]   ;;  %695 = vmatprep.mubr.bf16.mxu0 %v1748_v23  ;;  %v1778_v34 = vld [vmem:[#allocation8 + $0x38] sm:$0xff]  }
  0x56   : > { %1475 = vmatpush3.bf16.msra.mxu0 %v1729_v7  ;;  %1582 = vmatprep.mubr.bf16.mxu1 %v1749_v24  ;;  %v1746_v26 = vld [vmem:[%s2110_s11] ss:$12 sps:$4 sm:$0xff]   ;;  %v1751_v27 = vld [vmem:[%s2110_s11 + $0x1c] ss:$12 sps:$4 sm:$0xff]   ;;  %v1757_v29 = vld [vmem:[%s2110_s11 + $0x38] ss:$12 sps:$4 sm:$0xff]   ;;  %p1876_p3 = pnand %p1875_p13, %p1869_p10 }
  0x57   : > { %1476 = vmatprep.subr.bf16.mxu0 %v1731_v9  ;;  %v1750_v28 = vld [vmem:[%s2110_s11 + $0x20] ss:$12 sps:$4 sm:$0xff]   ;;  %v1753_v30 = vld [vmem:[%s2110_s11 + $0x18] ss:$12 sps:$4 sm:$0xff]   ;;  %v1765_v33 = vld [vmem:[%s2110_s11 + $0x68] ss:$12 sps:$4 sm:$0xff]  }
  0x58   : > { %1571 = vmatpush3.bf16.msra.mxu1 %v1730_v8  ;;  %v1756_v35 = vld [vmem:[%s2110_s11 + $0x30] ss:$12 sps:$4 sm:$0xff]   ;;  %v1759_v37 = vld [vmem:[%s2110_s11 + $0x4c] ss:$12 sps:$4 sm:$0xff]   ;;  %v1761_v40 = vld [vmem:[%s2110_s11 + $0x48] ss:$12 sps:$4 sm:$0xff]  }
  0x59   : > { %1572 = vmatprep.subr.bf16.mxu1 %v1733_v11  ;;  %v1779_v36 = vld [vmem:[#allocation8 + $0x30] sm:$0xff]   ;;  %v1766_v38 = vld [vmem:[%s2110_s11 + $0x80] ss:$12 sps:$4 sm:$0xff]   ;;  %v1773_v39 = vld [vmem:[%s2110_s11 + $0x98] ss:$12 sps:$4 sm:$0xff]  }
  0x5a   : > { %1477 = vmatpush3.bf16.msra.mxu0 %v1732_v10  ;;  %v1762_v41 = vld [vmem:[%s2110_s11 + $0x64] ss:$12 sps:$4 sm:$0xff]   ;;  %v1764_v43 = vld [vmem:[%s2110_s11 + $0x60] ss:$12 sps:$4 sm:$0xff]   ;;  %v1767_v44 = vld [vmem:[%s2110_s11 + $0x7c] ss:$12 sps:$4 sm:$0xff]  }
  0x5b   : > { %1478 = vmatprep.subr.bf16.mxu0 %v1734_v12  ;;  %v1774_v42 = vld [vmem:[%s2110_s11 + $0xb0] ss:$12 sps:$4 sm:$0xff]   ;;  %v1769_v45 = vld [vmem:[%s2110_s11 + $0x78] ss:$12 sps:$4 sm:$0xff]   ;;  %v1770_v46 = vld [vmem:[%s2110_s11 + $0x94] ss:$12 sps:$4 sm:$0xff]  }
  0x5c   : > { %1573 = vmatpush3.bf16.msra.mxu1 %v1733_v11  ;;  %v1772_v47 = vld [vmem:[%s2110_s11 + $0x90] ss:$12 sps:$4 sm:$0xff]   ;;  %v1775_v48 = vld [vmem:[%s2110_s11 + $0xac] ss:$12 sps:$4 sm:$0xff]   ;;  %v1777_v49 = vld [vmem:[%s2110_s11 + $0xa8] ss:$12 sps:$4 sm:$0xff]  }
  0x5d   : > { %1574 = vmatprep.subr.bf16.mxu1 %v1736_v13  ;;  %v1780_v50 = vld [vmem:[#allocation8 + $0x28] sm:$0xff]   ;;  %v1781_v51 = vld [vmem:[#allocation8 + $0x20] sm:$0xff]   ;;  %v1782_v52 = vld [vmem:[#allocation8 + $0x18] sm:$0xff]  }
  0x5e   : > { %1479 = vmatpush3.bf16.msra.mxu0 %v1735_v14  ;;  %v1783_v53 = vld [vmem:[#allocation8 + $0x10] sm:$0xff]   ;;  %v1784_v54 = vld [vmem:[#allocation8 + $0x8] sm:$0xff]   ;;  %v1785_v55 = vld [vmem:[#allocation8] sm:$0xff]  }
  0x5f   : > { %1480 = vmatprep.subr.bf16.mxu0 %v1737_v15  ;;  %v2147_v63 = vld [vmem:[%s2232_s2] ss:$0 sm:$0xff] }
  0x60   : > { %1575 = vmatpush3.bf16.msra.mxu1 %v1736_v13 }
  0x61   : > { %1576 = vmatprep.subr.bf16.mxu1 %v1739_v16 }
  0x62   : > { %1481 = vmatpush3.bf16.msra.mxu0 %v1738_v17 }
  0x63   : > { %1482 = vmatprep.subr.bf16.mxu0 %v1740_v18 }
  0x64   : > { %1577 = vmatpush3.bf16.msra.mxu1 %v1739_v16 }
  0x65   : > { %1578 = vmatprep.subr.bf16.mxu1 %v1742_v20 }
  0x66   : > { %1483 = vmatpush3.bf16.msra.mxu0 %v1741_v19 }
  0x67   : > { %1484 = vmatprep.subr.bf16.mxu0 %v1743_v21 }
  0x68   : > { %1579 = vmatpush3.bf16.msra.mxu1 %v1742_v20 }
  0x69   : > { %1580 = vmatprep.subr.bf16.mxu1 %v1745_v22 }
  0x6a   : > { %1485 = vmatpush3.bf16.msra.mxu0 %v1744_v25 }
  0x6c   : > { %1581 = vmatpush3.bf16.msra.mxu1 %v1745_v22 }
  0x6d   : > { %696 = vmatmul.mubr.bf16.vlgmr.msra.gmra.mxu0 %v1746_v26  ;;  %1598 = vmatprep.subr.bf16.mxu1 %v1778_v34 }
  0x6e   : > { %703 = vmatprep.mubr.bf16.mxu0 %v1751_v27 }
  0x6f   : > { %1583 = vmatmul.mubr.bf16.vlgmr.msra.gmra.mxu1 %v1750_v28 }
  0x70   : > { %1586 = vmatprep.mubr.bf16.mxu1 %v1757_v29  ;;  %1599 = vmatpush3.bf16.msra.mxu1 %v1778_v34 }
  0x71   : > { %1600 = vmatprep.subr.bf16.mxu1 %v1779_v36 }
  0x74   : > { %1601 = vmatpush3.bf16.msra.mxu1 %v1779_v36 }
  0x75   : > { %704 = vmatmul.mubr.bf16.gmra.mxu0 %v1753_v30  ;;  %1602 = vmatprep.subr.bf16.mxu1 %v1780_v50 }
  0x76   : > { %711 = vmatprep.mubr.bf16.mxu0 %v1754_v31 }
  0x77   : > { %1587 = vmatmul.mubr.bf16.gmra.mxu1 %v1758_v32 }
  0x78   : > { %1590 = vmatprep.mubr.bf16.mxu1 %v1765_v33  ;;  %1603 = vmatpush3.bf16.msra.mxu1 %v1780_v50 }
  0x79   : > { %1604 = vmatprep.subr.bf16.mxu1 %v1781_v51 }
  0x7c   : > { %1605 = vmatpush3.bf16.msra.mxu1 %v1781_v51 }
  0x7d   : > { %712 = vmatmul.mubr.bf16.gmra.mxu0 %v1756_v35  ;;  %1606 = vmatprep.subr.bf16.mxu1 %v1782_v52 }
  0x7e   : > { %719 = vmatprep.mubr.bf16.mxu0 %v1759_v37 }
  0x7f   : > { %1591 = vmatmul.mubr.bf16.gmra.mxu1 %v1766_v38 }
  0x80   : > { %1594 = vmatprep.mubr.bf16.mxu1 %v1773_v39  ;;  %1607 = vmatpush3.bf16.msra.mxu1 %v1782_v52 }
  0x81   : > { %1608 = vmatprep.subr.bf16.mxu1 %v1783_v53 }
  0x84   : > { %1609 = vmatpush3.bf16.msra.mxu1 %v1783_v53 }
  0x85   : > { %720 = vmatmul.mubr.bf16.gmra.mxu0 %v1761_v40  ;;  %1610 = vmatprep.subr.bf16.mxu1 %v1784_v54 }
  0x86   : > { %727 = vmatprep.mubr.bf16.mxu0 %v1762_v41 }
  0x87   : > { %1595 = vmatmul.mubr.bf16.gmra.mxu1 %v1774_v42 }
  0x88   : > { %1611 = vmatpush3.bf16.msra.mxu1 %v1784_v54 }
  0x89   : > { %1612 = vmatprep.subr.bf16.mxu1 %v1785_v55 }
  0x8c   : > { %1613 = vmatpush3.bf16.msra.mxu1 %v1785_v55 }
  0x8d   : > { %728 = vmatmul.mubr.bf16.gmra.mxu0 %v1764_v43 }
  0x8e   : > { %735 = vmatprep.mubr.bf16.mxu0 %v1767_v44 }
  0x95   : > { %736 = vmatmul.mubr.bf16.gmra.mxu0 %v1769_v45 }
  0x96   : > { %743 = vmatprep.mubr.bf16.mxu0 %v1770_v46 }
  0x9d   : > { %744 = vmatmul.mubr.bf16.gmra.mxu0 %v1772_v47 }
  0x9e   : > { %751 = vmatprep.mubr.bf16.mxu0 %v1775_v48 }
  0xa5   : > { %752 = vmatmul.mubr.bf16.gmra.mxu0 %v1777_v49 }
 0x12d   : > { %v1486_v56 = vpop.f32.mrf.mxu0 }
 0x12f   : > { %v1487_v57 = vpop.f32.mrf.mxu0  ;;  %v1584_v58 = vpop.f32.mrf.mxu1 }
 0x130   : > { %v1488_v59 = vadd.f32 %v1487_v57, %v1486_v56 }
 0x131   : > { %v1489_v60 = vpop.f32.mrf.mxu0  ;;  %v794_v61 = vpop.f32.mrf.mxu1 }
 0x132   : > { %v795_v62 = vadd.f32 %v1488_v59, %v794_v61 }
 0x133   : > { %v1490_v0 = vpop.f32.mrf.mxu0  ;;  %v1585_v1 = vpop.f32.mrf.mxu1 }
 0x134   : > { %v1491_v2 = vadd.f32 %v1490_v0, %v1489_v60  ;;  %v915_v5 = vadd.f32 %v2147_v63, %v795_v62 }
 0x135   : > { %v1492_v3 = vpop.f32.mrf.mxu0  ;;  %v797_v4 = vpop.f32.mrf.mxu1 }
 0x136   : > { %v798_v6 = vadd.f32 %v1491_v2, %v797_v4  ;;  %v931_v12 = vmax.f32 %v915_v5, 0.0 }
 0x137   : > { %v1493_v7 = vpop.f32.mrf.mxu0  ;;  %v1588_v8 = vpop.f32.mrf.mxu1 }
 0x138   : > { %v916_v9 = vadd.f32 %v2147_v63, %v798_v6  ;;  %v1494_v10 = vadd.f32 %v1493_v7, %v1492_v3 }
 0x139   : > { %v1495_v11 = vpop.f32.mrf.mxu0  ;;  %v810_v16 = vpop.f32.mrf.mxu1 }
 0x13a   : > { %v932_v13 = vmax.f32 %v916_v9, 0.0  ;;  %v803_v14 = vadd.f32 %v1584_v58, %v1494_v10 }
 0x13b   : > { %v1496_v15 = vpop.f32.mrf.mxu0  ;;  %v1589_v23 = vpop.f32.mrf.mxu1 }
 0x13c   : > { %v1497_v17 = vadd.f32 %v1496_v15, %v1495_v11  ;;  %v947_v18 = vpack.c.bf16 %v932_v13, %v931_v12  ;;  %v917_v20 = vadd.f32 %v2147_v63, %v803_v14 }
 0x13d   : > { %v1498_v19 = vpop.f32.mrf.mxu0  ;;  %v813_v31 = vpop.f32.mrf.mxu1 }
 0x13e   : > { %v806_v21 = vadd.f32 %v1585_v1, %v1497_v17  ;;  %1614 = vmatprep.mubr.bf16.mxu1 %v947_v18  ;;  %v933_v27 = vmax.f32 %v917_v20, 0.0 }
 0x13f   : > { %v1499_v22 = vpop.f32.mrf.mxu0  ;;  %v1592_v38 = vpop.f32.mrf.mxu1 }
 0x140   : > { %v918_v24 = vadd.f32 %v2147_v63, %v806_v21  ;;  %v1500_v25 = vadd.f32 %v1499_v22, %v1498_v19 }
 0x141   : > { %v1501_v26 = vpop.f32.mrf.mxu0  ;;  %v826_v46 = vpop.f32.mrf.mxu1 }
 0x142   : > { %v934_v28 = vmax.f32 %v918_v24, 0.0  ;;  %v811_v29 = vadd.f32 %v1500_v25, %v810_v16 }
 0x143   : > { %v1502_v30 = vpop.f32.mrf.mxu0  ;;  %v1593_v53 = vpop.f32.mrf.mxu1 }
 0x144   : > { %v948_v32 = vpack.c.bf16 %v934_v28, %v933_v27  ;;  %v1503_v33 = vadd.f32 %v1502_v30, %v1501_v26  ;;  %v919_v35 = vadd.f32 %v2147_v63, %v811_v29 }
 0x145   : > { %v1504_v34 = vpop.f32.mrf.mxu0  ;;  %v829_v61 = vpop.f32.mrf.mxu1 }
 0x146   : > { %v814_v36 = vadd.f32 %v1503_v33, %v813_v31  ;;  %1615 = vmatmul.mubr.bf16.vlgmr.msra.gmra.mxu1 %v948_v32  ;;  %v935_v42 = vmax.f32 %v919_v35, 0.0 }
 0x147   : > { %v1505_v37 = vpop.f32.mrf.mxu0  ;;  %v1596_v5 = vpop.f32.mrf.mxu1 }
 0x148   : > { %v920_v39 = vadd.f32 %v2147_v63, %v814_v36  ;;  %v1506_v40 = vadd.f32 %v1505_v37, %v1504_v34 }
 0x149   : > { %v1507_v41 = vpop.f32.mrf.mxu0  ;;  %v842_v13 = vpop.f32.mrf.mxu1 }
 0x14a   : > { %v936_v43 = vmax.f32 %v920_v39, 0.0  ;;  %v819_v44 = vadd.f32 %v1588_v8, %v1506_v40 }
 0x14b   : > { %v1508_v45 = vpop.f32.mrf.mxu0  ;;  %v1597_v20 = vpop.f32.mrf.mxu1 }
 0x14c   : > { %v1509_v47 = vadd.f32 %v1508_v45, %v1507_v41  ;;  %v949_v48 = vpack.c.bf16 %v936_v43, %v935_v42  ;;  %v921_v50 = vadd.f32 %v2147_v63, %v819_v44 }
 0x14d   : > { %v1510_v49 = vpop.f32.mrf.mxu0  ;;  %v845_v28 = vpop.f32.mrf.mxu1 }
 0x14e   : > { %v822_v51 = vadd.f32 %v1589_v23, %v1509_v47  ;;  %1618 = vmatprep.mubr.bf16.mxu1 %v949_v48  ;;  %v937_v57 = vmax.f32 %v921_v50, 0.0 }
 0x14f   : > { %v1511_v52 = vpop.f32.mrf.mxu0 }
 0x150   : > { %v922_v54 = vadd.f32 %v2147_v63, %v822_v51  ;;  %v1512_v55 = vadd.f32 %v1511_v52, %v1510_v49 }
 0x151   : > { %v1513_v56 = vpop.f32.mrf.mxu0 }
 0x152   : > { %v938_v58 = vmax.f32 %v922_v54, 0.0  ;;  %v827_v59 = vadd.f32 %v1512_v55, %v826_v46 }
 0x153   : > { %v1514_v60 = vpop.f32.mrf.mxu0 }
 0x154   : > { %v1515_v62 = vadd.f32 %v1514_v60, %v1513_v56  ;;  %v950_v0 = vpack.c.bf16 %v938_v58, %v937_v57  ;;  %v923_v2 = vadd.f32 %v2147_v63, %v827_v59 }
 0x155   : > { %v1516_v1 = vpop.f32.mrf.mxu0 }
 0x156   : > { %v830_v3 = vadd.f32 %v1515_v62, %v829_v61  ;;  %1619 = vmatmul.mubr.bf16.gmra.mxu1 %v950_v0  ;;  %v939_v9 = vmax.f32 %v923_v2, 0.0 }
 0x157   : > { %v1517_v4 = vpop.f32.mrf.mxu0 }
 0x158   : > { %v924_v6 = vadd.f32 %v2147_v63, %v830_v3  ;;  %v1518_v7 = vadd.f32 %v1517_v4, %v1516_v1 }
 0x159   : > { %v1519_v8 = vpop.f32.mrf.mxu0 }
 0x15a   : > { %v940_v10 = vmax.f32 %v924_v6, 0.0  ;;  %v835_v11 = vadd.f32 %v1592_v38, %v1518_v7 }
 0x15b   : > { %v1520_v12 = vpop.f32.mrf.mxu0 }
 0x15c   : > { %v1521_v14 = vadd.f32 %v1520_v12, %v1519_v8  ;;  %v951_v15 = vpack.c.bf16 %v940_v10, %v939_v9  ;;  %v925_v17 = vadd.f32 %v2147_v63, %v835_v11 }
 0x15d   : > { %v1522_v16 = vpop.f32.mrf.mxu0 }
 0x15e   : > { %v838_v18 = vadd.f32 %v1593_v53, %v1521_v14  ;;  %1622 = vmatprep.mubr.bf16.mxu1 %v951_v15  ;;  %v941_v24 = vmax.f32 %v925_v17, 0.0 }
 0x15f   : > { %v1523_v19 = vpop.f32.mrf.mxu0 }
 0x160   : > { %v926_v21 = vadd.f32 %v2147_v63, %v838_v18  ;;  %v1524_v22 = vadd.f32 %v1523_v19, %v1522_v16 }
 0x161   : > { %v1525_v23 = vpop.f32.mrf.mxu0 }
 0x162   : > { %v942_v25 = vmax.f32 %v926_v21, 0.0  ;;  %v843_v26 = vadd.f32 %v1524_v22, %v842_v13 }
 0x163   : > { %v1526_v27 = vpop.f32.mrf.mxu0 }
 0x164   : > { %v1527_v29 = vadd.f32 %v1526_v27, %v1525_v23  ;;  %v952_v30 = vpack.c.bf16 %v942_v25, %v941_v24  ;;  %v927_v32 = vadd.f32 %v2147_v63, %v843_v26 }
 0x165   : > { %v1528_v31 = vpop.f32.mrf.mxu0 }
 0x166   : > { %v846_v33 = vadd.f32 %v1527_v29, %v845_v28  ;;  %1623 = vmatmul.mubr.bf16.gmra.mxu1 %v952_v30  ;;  %v943_v38 = vmax.f32 %v927_v32, 0.0 }
 0x167   : > { %v1529_v34 = vpop.f32.mrf.mxu0 }
 0x168   : > { %v928_v35 = vadd.f32 %v2147_v63, %v846_v33  ;;  %v1530_v36 = vadd.f32 %v1529_v34, %v1528_v31 }
 0x169   : > { %v1531_v37 = vpop.f32.mrf.mxu0 }
 0x16a   : > { %v944_v39 = vmax.f32 %v928_v35, 0.0  ;;  %v851_v40 = vadd.f32 %v1596_v5, %v1530_v36 }
 0x16b   : > { %v1532_v41 = vpop.f32.mrf.mxu0 }
 0x16c   : > { %v1533_v42 = vadd.f32 %v1532_v41, %v1531_v37  ;;  %v953_v43 = vpack.c.bf16 %v944_v39, %v943_v38  ;;  %v929_v44 = vadd.f32 %v2147_v63, %v851_v40 }
 0x16e   : > { %v854_v45 = vadd.f32 %v1597_v20, %v1533_v42  ;;  %1626 = vmatprep.mubr.bf16.mxu1 %v953_v43  ;;  %v945_v47 = vmax.f32 %v929_v44, 0.0 }
 0x170   : > { %v930_v46 = vadd.f32 %v2147_v63, %v854_v45 }
 0x172   : > { %v946_v48 = vmax.f32 %v930_v46, 0.0 }
 0x174   : > { %v954_v49 = vpack.c.bf16 %v946_v48, %v945_v47 }
 0x176   : > { %1627 = vmatmul.mubr.bf16.gmra.mxu1 %v954_v49 }
 0x206   : > { %v1616_v50 = vpop.f32.mrf.mxu1 }
 0x208   : > { %v1053_v51 = vpop.f32.mrf.mxu1 }
 0x20a   : > { %v1617_v52 = vpop.f32.mrf.mxu1 }
 0x20b   : > { %v1431_v53 = vpack.c.bf16 %v1617_v52, %v1616_v50 }
 0x20c   : > { %v1056_v54 = vpop.f32.mrf.mxu1 }
 0x20d   : > { %1463 = vst [vmem:[%s2166_s6 + $0x8] sm:$0xff] %v1431_v53   ;;  %v1426_v55 = vpack.c.bf16 %v1056_v54, %v1053_v51 }
 0x20f   : > { %1427 = vst [vmem:[%s2166_s6] sm:$0xff] %v1426_v55  }
 0x216   : > { %v1620_v63 = vpop.f32.mrf.mxu1 }
 0x218   : > { %v1069_v56 = vpop.f32.mrf.mxu1 }
 0x21a   : > { %v1621_v57 = vpop.f32.mrf.mxu1 }
 0x21b   : > { %v1441_v58 = vpack.c.bf16 %v1621_v57, %v1620_v63 }
 0x21c   : > { %v1072_v59 = vpop.f32.mrf.mxu1 }
 0x21d   : > { %1465 = vst [vmem:[%s2166_s6 + $0x18] sm:$0xff] %v1441_v58   ;;  %v1436_v60 = vpack.c.bf16 %v1072_v59, %v1069_v56 }
 0x21f   : > { %1464 = vst [vmem:[%s2166_s6 + $0x10] sm:$0xff] %v1436_v60  }
 0x226   : > { %v1624_v61 = vpop.f32.mrf.mxu1 }
 0x228   : > { %v1085_v62 = vpop.f32.mrf.mxu1 }
 0x22a   : > { %v1625_v0 = vpop.f32.mrf.mxu1 }
 0x22b   : > { %v1451_v1 = vpack.c.bf16 %v1625_v0, %v1624_v61 }
 0x22c   : > { %v1088_v2 = vpop.f32.mrf.mxu1 }
 0x22d   : > { %1467 = vst [vmem:[%s2166_s6 + $0x28] sm:$0xff] %v1451_v1   ;;  %v1446_v3 = vpack.c.bf16 %v1088_v2, %v1085_v62 }
 0x22f   : > { %1466 = vst [vmem:[%s2166_s6 + $0x20] sm:$0xff] %v1446_v3  }
 0x236   : > { %v1628_v4 = vpop.f32.mrf.mxu1 }
 0x238   : > { %v1101_v5 = vpop.f32.mrf.mxu1 }
 0x23a   : > { %v1629_v6 = vpop.f32.mrf.mxu1 }
 0x23b   : > { %v1461_v7 = vpack.c.bf16 %v1629_v6, %v1628_v4 }
 0x23c   : > { %v1104_v8 = vpop.f32.mrf.mxu1 }
 0x23d   : > { %1469 = vst [vmem:[%s2166_s6 + $0x38] sm:$0xff] %v1461_v7   ;;  %v1456_v9 = vpack.c.bf16 %v1104_v8, %v1101_v5 }
 0x23f   : > { %1468 = vst [vmem:[%s2166_s6 + $0x30] sm:$0xff] %v1456_v9  }
 0x240   : > { %1879 = shalt.err (!%p1876_p3)
}
 0x241   : > { %s1880_s9 = scalar_lea.hbm %s2181_s14, 1024  ;;  %s1884_s23 = scalar_lea.hbm %s2234_s4, 3072 }
 0x242   : > { %p1881_p0 = scmp.ne.s32.totalorder %s2181_s14, %s1880_s9  ;;  %p1885_p6 = scmp.lt.s32.totalorder %s2181_s14, %s2234_s4 }
 0x243   : > { %p1886_p11 = scmp.lt.s32.totalorder %s1884_s23, %s1880_s9 }
 0x244   : > { %p1882_p1 = pnand %p1881_p0, %p2081_p7 }
 0x245   : > { %p1887_p5 = por %p1886_p11, %p1885_p6 }
 0x246   : > { %p1883_p4 = pneg %p1882_p1 }
 0x248   : > { %p1888_p8 = pnand %p1887_p5, %p1883_p4 }
 0x24a   : > { %1891 = shalt.err (!%p1888_p8)
}
 0x24b   : > { %s1960_s6 = smov 64   ;;  %s1961_s24 = smov 4  }
 0x24c   : > { %1643 = dma.vmem_to_hbm [thread:$0]  (%p2081_p7), %s2176_s10, 1024, %s2181_s14, %s1197_s29, %s1960_s6, %s1960_s6, %s1961_s24  }
 0x24d PF: > { %p1665_p9 = scmp.ge.s32.totalorder %s1950_s20, 2  ;;  %s1225_s12 = sand.u32 1, %s1930_s15  }
 0x24e   : > { %p2250_p10 = scmp.ne.s32.totalorder %s2242_s26, 0  ;;  %s1226_s13 = scalar_lea.sflag [#allocation5], %s1225_s12 }
 0x250   : > { %p1657_p2 = pnand %p1665_p9, %p2250_p10 }
 0x252   : > { %p1658_p12 = pneg %p1657_p2 }
 0x254   : > { %1925 = dma.done.wait (%p1658_p12), %s1226_s13, 1024  }
 0x255   : > { %1927 = vsyncadd (%p1658_p12), %s1226_s13, 4294966272  ;;  %s21_s20 = sadd.s32 1, %s1950_s20   ;;  %s2251_s15 = smov %s1934_s16 }
 0x256   : > { %p18_p13 = scmp.ge.s32.totalorder %s21_s20, 5   ;;  %s2252_s16 = smov %s1938_s17 }
 0x257   : > { %s2253_s17 = smov %s2093_s7  ;;  %s2254_s18 = smov %s1946_s19 }
 0x258   : > { %s2255_s19 = smov %s2257_s21  ;;  %20 = sbr.rel (!%p18_p13) target bundleno = 9 (0x9), region = 98 }
 0x25d   :  { %1231 = vsyncpa [#allocation4], 1 }
 0x25e   :  { %1233 = vsyncpa [#allocation4 + $0x1], 1 }
 0x25f   :  { %1234 = vsyncpa [#allocation7], 1 }
 0x260   :  { %1235 = vsyncpa [#allocation5], 1 }
 0x261   :  { %1237 = vsyncpa [#allocation5 + $0x1], 1 }

</bundles_post_ra>
